<compile_context>
chip_gen: v6e
topology: v6e:2x2x1
jax: 0.10.0
libtpu: 0.0.40
codegen_flags: <defaults>
</compile_context>

<pallas_src>
import math
from functools import partial

import jax
import jax.numpy as jnp
from jax.experimental import pallas as pl
from jax.experimental.pallas import tpu as pltpu

KSIZE = 3  # resblock uses 3x3, stride 1, padding 1


# ----------------------------- Pallas kernel -----------------------------

def _resblock_kernel(xb_ref, mask_ref, w1_ref, b1_ref, w2_ref, b2_ref,
                     o_ref, hbuf_ref, *, wp, cout, ksize, margin, npos):
    """Whole resblock for one image, fully resident in VMEM.

    xb_ref  : (1, Cin, BUF) f32  zero-margined, spatially padded image,
                                 channel-major, flattened spatial on lanes.
    mask_ref: (1, NPOS)     f32  1.0 at real (interior) output positions.
    w*_ref  : (2*Cout, k*k*Cin) bf16 pre-transposed conv weights.
    b*_ref  : (2*Cout, 1)   f32  biases.
    o_ref   : (1, Cout, NPOS) f32 output (lane-dense, NPOS multiple of 128).
    hbuf_ref: (Cout, BUF) bf16 scratch: conv1 output re-staged in its own
              zero-margined padded form so conv2 gets 'same' padding for free.
    """
    mask = mask_ref[...]                                  # (1, NPOS)
    x_res = xb_ref[0, :, margin:margin + npos]            # (Cin, NPOS) f32 residual

    def conv_mfm(src_bf, w_ref, b_ref):
        # Stack the k*k shifted windows once -> ONE bf16 MXU matmul (K=k*k*Cin).
        wins = []
        for di in range(ksize):
            for dj in range(ksize):
                off = (di - ksize // 2) * wp + (dj - ksize // 2)
                start = margin + off                      # static, >= 0
                wins.append(src_bf[:, start:start + npos])
        xs = jnp.concatenate(wins, axis=0)                # (k*k*cin, NPOS) bf16
        acc = jnp.dot(w_ref[...], xs,
                      preferred_element_type=jnp.float32) + b_ref[...]
        return jnp.maximum(acc[:cout], acc[cout:])        # MFM -> (cout, NPOS) f32

    # conv1 + MFM straight from the padded input.
    h = conv_mfm(xb_ref[0].astype(jnp.bfloat16), w1_ref, b1_ref)

    # Re-pad conv1's output in VMEM: mask zeroes the spatial border (and the
    # lane tail), the margins stay zero from the full clear below.
    hbuf_ref[...] = jnp.zeros_like(hbuf_ref)
    hbuf_ref[:, margin:margin + npos] = (h * mask).astype(jnp.bfloat16)

    # conv2 + MFM + fused residual add (Cin == Cout for resblock).
    out = conv_mfm(hbuf_ref[...], w2_ref, b2_ref) + x_res
    o_ref[0] = out


# ----------------------------- kernel wrapper -----------------------------

def resblock_forward(params, x):
    """x: (B, C, H, W) float32 (PyTorch NCHW). Returns (B, C, H, W) float32."""
    w1, b1 = params["conv1"]
    w2, b2 = params["conv2"]
    B, C, H, W = x.shape
    c2 = w1.shape[0]
    cout = c2 // 2
    assert cout == C, "resblock requires in_channels == out_channels"

    padn = KSIZE // 2
    hp, wp = H + 2 * padn, W + 2 * padn
    hpwp = hp * wp
    npos = max(128, ((hpwp + 127) // 128) * 128)      # lane-dense output width
    margin = (KSIZE // 2) * (wp + 1)                  # max |tap offset| in flat coords
    buf = ((2 * margin + npos + 127) // 128) * 128    # margined buffer length
    taps = KSIZE * KSIZE

    # Padded, channel-major, flat-spatial image with zero margins on the lane
    # axis (exactly the NCHW layout PyTorch already uses -> no transposes).
    xp = jnp.pad(x.astype(jnp.float32),
                 ((0, 0), (0, 0), (padn, padn), (padn, padn)))
    xp = xp.reshape(B, C, hpwp)
    xb = jnp.pad(xp, ((0, 0), (0, 0), (margin, buf - margin - hpwp)))

    # Interior mask over the NPOS output positions (1.0 at real pixels).
    ii = jnp.arange(hp)
    jj = jnp.arange(wp)
    inner = (((ii >= padn) & (ii < padn + H))[:, None]
             & ((jj >= padn) & (jj < padn + W))[None, :])
    mask = jnp.pad(inner.reshape(1, hpwp).astype(jnp.float32),
                   ((0, 0), (0, npos - hpwp)))

    kern = partial(_resblock_kernel, wp=wp, cout=cout, ksize=KSIZE,
                   margin=margin, npos=npos)
    out = pl.pallas_call(
        kern,
        out_shape=jax.ShapeDtypeStruct((B, cout, npos), jnp.float32),
        grid=(B,),
        in_specs=[
            pl.BlockSpec((1, C, buf), lambda b: (b, 0, 0)),
            pl.BlockSpec((1, npos), lambda b: (0, 0)),
            pl.BlockSpec((c2, taps * C), lambda b: (0, 0)),
            pl.BlockSpec((c2, 1), lambda b: (0, 0)),
            pl.BlockSpec((c2, taps * cout), lambda b: (0, 0)),
            pl.BlockSpec((c2, 1), lambda b: (0, 0)),
        ],
        out_specs=pl.BlockSpec((1, cout, npos), lambda b: (b, 0, 0)),
        scratch_shapes=[pltpu.VMEM((cout, buf), jnp.bfloat16)],
        compiler_params=pltpu.CompilerParams(
            dimension_semantics=("parallel",)),
    )(xb, mask, w1, b1, w2, b2)

    # Drop the lane tail, unflatten, slice away the spatial padding -> NCHW.
    out = out[:, :, :hpwp].reshape(B, cout, hp, wp)
    return out[:, :, padn:padn + H, padn:padn + W]


# ----------------------------- parameters -----------------------------

def init_resblock_params(key, in_channels, out_channels, ksize=KSIZE):
    """Raw PyTorch-layout params: conv weight (2*Cout, Cin, k, k), bias (2*Cout,)."""
    def conv_init(k, cin, cout2):
        kw_, kb_ = jax.random.split(k)
        bound = 1.0 / math.sqrt(cin * ksize * ksize)
        w = jax.random.uniform(kw_, (cout2, cin, ksize, ksize),
                               jnp.float32, -bound, bound)
        b = jax.random.uniform(kb_, (cout2,), jnp.float32, -bound, bound)
        return w, b

    k1, k2 = jax.random.split(key)
    return {"conv1": conv_init(k1, in_channels, 2 * out_channels),
            "conv2": conv_init(k2, out_channels, 2 * out_channels)}


def prepare_params(raw, ksize=KSIZE):
    """One-time transform: OIHW -> (2*Cout, k*k*Cin) bf16 matmul weight, (2*Cout,1) f32 bias."""
    def prep(w, b):
        c2, cin, kh, kw = w.shape
        assert kh == kw == ksize, "square kernel expected"
        # column ordering matches the in-kernel window stack: (di, dj, ci)
        w_mat = jnp.transpose(w, (0, 2, 3, 1)).reshape(c2, kh * kw * cin)
        return w_mat.astype(jnp.bfloat16), b.astype(jnp.float32).reshape(c2, 1)

    return {name: prep(*wb) for name, wb in raw.items()}


# ----------------------------- pure-JAX reference -----------------------------

def _ref_mfm_conv(x, w, b):
    y = jax.lax.conv_general_dilated(
        x, w, window_strides=(1, 1), padding=((1, 1), (1, 1)),
        dimension_numbers=("NCHW", "OIHW", "NCHW"))
    y = y + b[None, :, None, None]
    c = y.shape[1] // 2
    return jnp.maximum(y[:, :c], y[:, c:])


def resblock_reference(raw, x):
    h = _ref_mfm_conv(x, *raw["conv1"])
    return _ref_mfm_conv(h, *raw["conv2"]) + x


# ----------------------------- main -----------------------------

if __name__ == "__main__":
    key = jax.random.PRNGKey(0)
    kp, kx = jax.random.split(key)

    B, C, H, W = 2, 4, 16, 16          # resblock requires in_channels == out_channels
    x = jax.random.normal(kx, (B, C, H, W), jnp.float32)

    raw = init_resblock_params(kp, C, C)
    params = prepare_params(raw)

    out = jax.jit(resblock_forward)(params, x)
    out = jax.block_until_ready(out)
    assert out.shape == (B, C, H, W) and out.dtype == jnp.float32

    ref = resblock_reference(raw, x)
    max_err = float(jnp.max(jnp.abs(out - ref)))
    assert max_err < 5e-2, f"mismatch vs reference: {max_err}"

    print("KERNEL_OK")
</pallas_src>

<mosaic_0001>
module attributes {stable_mosaic.version = 11 : i64} {
  func.func @_resblock_kernel(%arg0: i32, %arg1: memref<1x4x512xf32, #tpu.memory_space<vmem>>, %arg2: memref<1x384xf32, #tpu.memory_space<vmem>>, %arg3: memref<8x36xbf16, #tpu.memory_space<vmem>>, %arg4: memref<8x1xf32, #tpu.memory_space<vmem>>, %arg5: memref<8x36xbf16, #tpu.memory_space<vmem>>, %arg6: memref<8x1xf32, #tpu.memory_space<vmem>>, %arg7: memref<1x4x384xf32, #tpu.memory_space<vmem>>, %arg8: memref<4x512xbf16, #tpu.memory_space<vmem>>) attributes {dimension_semantics = [#tpu.dimension_semantics<parallel>], iteration_bounds = array<i64: 2>, scalar_prefetch = 0 : i64, scratch_operands = 1 : i64, tpu.core_type = #tpu.core_type<tc>, window_params = [{transform_indices = @transform_0, window_bounds = array<i64: 1, 4, 512>}, {pipeline_mode = #tpu.pipeline_mode<synchronous>, transform_indices = @transform_1, window_bounds = array<i64: 1, 384>}, {pipeline_mode = #tpu.pipeline_mode<synchronous>, transform_indices = @transform_2, window_bounds = array<i64: 8, 36>}, {pipeline_mode = #tpu.pipeline_mode<synchronous>, transform_indices = @transform_3, window_bounds = array<i64: 8, 1>}, {pipeline_mode = #tpu.pipeline_mode<synchronous>, transform_indices = @transform_4, window_bounds = array<i64: 8, 36>}, {pipeline_mode = #tpu.pipeline_mode<synchronous>, transform_indices = @transform_5, window_bounds = array<i64: 8, 1>}, {transform_indices = @transform_6, window_bounds = array<i64: 1, 4, 384>}]} {
    %c0 = arith.constant 0 : index
    %c0_0 = arith.constant 0 : index
    %0 = vector.load %arg2[%c0, %c0_0] : memref<1x384xf32, #tpu.memory_space<vmem>>, vector<1x384xf32>
    %c0_1 = arith.constant 0 : index
    %c0_2 = arith.constant 0 : index
    %c19 = arith.constant 19 : index
    %1 = vector.load %arg1[%c0_1, %c0_2, %c19] : memref<1x4x512xf32, #tpu.memory_space<vmem>>, vector<1x4x384xf32>
    %2 = vector.shape_cast %1 : vector<1x4x384xf32> to vector<4x384xf32>
    %c0_3 = arith.constant 0 : index
    %c0_4 = arith.constant 0 : index
    %c0_5 = arith.constant 0 : index
    %3 = vector.load %arg1[%c0_3, %c0_4, %c0_5] : memref<1x4x512xf32, #tpu.memory_space<vmem>>, vector<1x4x512xf32>
    %4 = vector.shape_cast %3 : vector<1x4x512xf32> to vector<4x512xf32>
    %5 = arith.truncf %4 : vector<4x512xf32> to vector<4x512xbf16>
    %6 = vector.extract_strided_slice %5 {offsets = [0, 0], sizes = [4, 384], strides = [1, 1]} : vector<4x512xbf16> to vector<4x384xbf16>
    %7 = vector.extract_strided_slice %5 {offsets = [0, 1], sizes = [4, 384], strides = [1, 1]} : vector<4x512xbf16> to vector<4x384xbf16>
    %8 = vector.extract_strided_slice %5 {offsets = [0, 2], sizes = [4, 384], strides = [1, 1]} : vector<4x512xbf16> to vector<4x384xbf16>
    %9 = vector.extract_strided_slice %5 {offsets = [0, 18], sizes = [4, 384], strides = [1, 1]} : vector<4x512xbf16> to vector<4x384xbf16>
    %10 = vector.extract_strided_slice %5 {offsets = [0, 19], sizes = [4, 384], strides = [1, 1]} : vector<4x512xbf16> to vector<4x384xbf16>
    %11 = vector.extract_strided_slice %5 {offsets = [0, 20], sizes = [4, 384], strides = [1, 1]} : vector<4x512xbf16> to vector<4x384xbf16>
    %12 = vector.extract_strided_slice %5 {offsets = [0, 36], sizes = [4, 384], strides = [1, 1]} : vector<4x512xbf16> to vector<4x384xbf16>
    %13 = vector.extract_strided_slice %5 {offsets = [0, 37], sizes = [4, 384], strides = [1, 1]} : vector<4x512xbf16> to vector<4x384xbf16>
    %14 = vector.extract_strided_slice %5 {offsets = [0, 38], sizes = [4, 384], strides = [1, 1]} : vector<4x512xbf16> to vector<4x384xbf16>
    %15 = tpu.concatenate %6, %7, %8, %9, %10, %11, %12, %13, %14 in 0 : vector<4x384xbf16>, vector<4x384xbf16>, vector<4x384xbf16>, vector<4x384xbf16>, vector<4x384xbf16>, vector<4x384xbf16>, vector<4x384xbf16>, vector<4x384xbf16>, vector<4x384xbf16> -> vector<36x384xbf16>
    %c0_6 = arith.constant 0 : index
    %c0_7 = arith.constant 0 : index
    %16 = vector.load %arg3[%c0_6, %c0_7] : memref<8x36xbf16, #tpu.memory_space<vmem>>, vector<8x36xbf16>
    %cst = arith.constant dense<0.000000e+00> : vector<8x384xf32>
    %17 = tpu.matmul %16, %15, %cst {dimension_numbers = #tpu.dot_dimension_numbers<[1], [0], [0], [1], [0, 0, 1, 1], [], []>} : vector<8x36xbf16>, vector<36x384xbf16>, vector<8x384xf32> -> vector<8x384xf32>
    %c0_8 = arith.constant 0 : index
    %c0_9 = arith.constant 0 : index
    %18 = vector.load %arg4[%c0_8, %c0_9] : memref<8x1xf32, #tpu.memory_space<vmem>>, vector<8x1xf32>
    %19 = vector.broadcast %18 : vector<8x1xf32> to vector<8x384xf32>
    %20 = arith.addf %17, %19 : vector<8x384xf32>
    %21 = vector.extract_strided_slice %20 {offsets = [0, 0], sizes = [4, 384], strides = [1, 1]} : vector<8x384xf32> to vector<4x384xf32>
    %22 = vector.extract_strided_slice %20 {offsets = [4, 0], sizes = [4, 384], strides = [1, 1]} : vector<8x384xf32> to vector<4x384xf32>
    %23 = arith.maximumf %21, %22 : vector<4x384xf32>
    %cst_10 = arith.constant 0.000000e+00 : bf16
    %24 = vector.broadcast %cst_10 : bf16 to vector<4x512xbf16>
    %c0_11 = arith.constant 0 : index
    %c0_12 = arith.constant 0 : index
    %25 = vector.load %arg8[%c0_11, %c0_12] : memref<4x512xbf16, #tpu.memory_space<vmem>>, vector<4x512xbf16>
    tpu.vector_store %arg8[%c0_11, %c0_12], %24 {strides = array<i32>} : memref<4x512xbf16, #tpu.memory_space<vmem>>, vector<4x512xbf16>,
    %26 = vector.broadcast %0 : vector<1x384xf32> to vector<4x384xf32>
    %27 = arith.mulf %23, %26 : vector<4x384xf32>
    %28 = arith.truncf %27 : vector<4x384xf32> to vector<4x384xbf16>
    %c0_13 = arith.constant 0 : index
    %c19_14 = arith.constant 19 : index
    %29 = vector.load %arg8[%c0_13, %c19_14] : memref<4x512xbf16, #tpu.memory_space<vmem>>, vector<4x384xbf16>
    tpu.vector_store %arg8[%c0_13, %c19_14], %28 {strides = array<i32>} : memref<4x512xbf16, #tpu.memory_space<vmem>>, vector<4x384xbf16>,
    %c0_15 = arith.constant 0 : index
    %c0_16 = arith.constant 0 : index
    %30 = vector.load %arg8[%c0_15, %c0_16] : memref<4x512xbf16, #tpu.memory_space<vmem>>, vector<4x512xbf16>
    %31 = vector.extract_strided_slice %30 {offsets = [0, 0], sizes = [4, 384], strides = [1, 1]} : vector<4x512xbf16> to vector<4x384xbf16>
    %32 = vector.extract_strided_slice %30 {offsets = [0, 1], sizes = [4, 384], strides = [1, 1]} : vector<4x512xbf16> to vector<4x384xbf16>
    %33 = vector.extract_strided_slice %30 {offsets = [0, 2], sizes = [4, 384], strides = [1, 1]} : vector<4x512xbf16> to vector<4x384xbf16>
    %34 = vector.extract_strided_slice %30 {offsets = [0, 18], sizes = [4, 384], strides = [1, 1]} : vector<4x512xbf16> to vector<4x384xbf16>
    %35 = vector.extract_strided_slice %30 {offsets = [0, 19], sizes = [4, 384], strides = [1, 1]} : vector<4x512xbf16> to vector<4x384xbf16>
    %36 = vector.extract_strided_slice %30 {offsets = [0, 20], sizes = [4, 384], strides = [1, 1]} : vector<4x512xbf16> to vector<4x384xbf16>
    %37 = vector.extract_strided_slice %30 {offsets = [0, 36], sizes = [4, 384], strides = [1, 1]} : vector<4x512xbf16> to vector<4x384xbf16>
    %38 = vector.extract_strided_slice %30 {offsets = [0, 37], sizes = [4, 384], strides = [1, 1]} : vector<4x512xbf16> to vector<4x384xbf16>
    %39 = vector.extract_strided_slice %30 {offsets = [0, 38], sizes = [4, 384], strides = [1, 1]} : vector<4x512xbf16> to vector<4x384xbf16>
    %40 = tpu.concatenate %31, %32, %33, %34, %35, %36, %37, %38, %39 in 0 : vector<4x384xbf16>, vector<4x384xbf16>, vector<4x384xbf16>, vector<4x384xbf16>, vector<4x384xbf16>, vector<4x384xbf16>, vector<4x384xbf16>, vector<4x384xbf16>, vector<4x384xbf16> -> vector<36x384xbf16>
    %c0_17 = arith.constant 0 : index
    %c0_18 = arith.constant 0 : index
    %41 = vector.load %arg5[%c0_17, %c0_18] : memref<8x36xbf16, #tpu.memory_space<vmem>>, vector<8x36xbf16>
    %cst_19 = arith.constant dense<0.000000e+00> : vector<8x384xf32>
    %42 = tpu.matmul %41, %40, %cst_19 {dimension_numbers = #tpu.dot_dimension_numbers<[1], [0], [0], [1], [0, 0, 1, 1], [], []>} : vector<8x36xbf16>, vector<36x384xbf16>, vector<8x384xf32> -> vector<8x384xf32>
    %c0_20 = arith.constant 0 : index
    %c0_21 = arith.constant 0 : index
    %43 = vector.load %arg6[%c0_20, %c0_21] : memref<8x1xf32, #tpu.memory_space<vmem>>, vector<8x1xf32>
    %44 = vector.broadcast %43 : vector<8x1xf32> to vector<8x384xf32>
    %45 = arith.addf %42, %44 : vector<8x384xf32>
    %46 = vector.extract_strided_slice %45 {offsets = [0, 0], sizes = [4, 384], strides = [1, 1]} : vector<8x384xf32> to vector<4x384xf32>
    %47 = vector.extract_strided_slice %45 {offsets = [4, 0], sizes = [4, 384], strides = [1, 1]} : vector<8x384xf32> to vector<4x384xf32>
    %48 = arith.maximumf %46, %47 : vector<4x384xf32>
    %49 = arith.addf %48, %2 : vector<4x384xf32>
    %c0_22 = arith.constant 0 : index
    %c0_23 = arith.constant 0 : index
    %c0_24 = arith.constant 0 : index
    %50 = vector.load %arg7[%c0_22, %c0_23, %c0_24] : memref<1x4x384xf32, #tpu.memory_space<vmem>>, vector<1x4x384xf32>
    %51 = vector.shape_cast %50 : vector<1x4x384xf32> to vector<4x384xf32>
    %52 = vector.shape_cast %49 : vector<4x384xf32> to vector<1x4x384xf32>
    tpu.vector_store %arg7[%c0_22, %c0_23, %c0_24], %52 {strides = array<i32>} : memref<1x4x384xf32, #tpu.memory_space<vmem>>, vector<1x4x384xf32>,
    return
  }
  func.func @transform_0(%arg0: i32) -> (i32, i32, i32) {
    %c0_i32 = arith.constant 0 : i32
    %c0_i32_0 = arith.constant 0 : i32
    %c0_i32_1 = arith.constant 0 : i32
    return %arg0, %c0_i32, %c0_i32_0 : i32, i32, i32
  }
  func.func @transform_1(%arg0: i32) -> (i32, i32) {
    %c0_i32 = arith.constant 0 : i32
    %c0_i32_0 = arith.constant 0 : i32
    %c0_i32_1 = arith.constant 0 : i32
    return %c0_i32, %c0_i32_0 : i32, i32
  }
  func.func @transform_2(%arg0: i32) -> (i32, i32) {
    %c0_i32 = arith.constant 0 : i32
    %c0_i32_0 = arith.constant 0 : i32
    %c0_i32_1 = arith.constant 0 : i32
    return %c0_i32, %c0_i32_0 : i32, i32
  }
  func.func @transform_3(%arg0: i32) -> (i32, i32) {
    %c0_i32 = arith.constant 0 : i32
    %c0_i32_0 = arith.constant 0 : i32
    %c0_i32_1 = arith.constant 0 : i32
    return %c0_i32, %c0_i32_0 : i32, i32
  }
  func.func @transform_4(%arg0: i32) -> (i32, i32) {
    %c0_i32 = arith.constant 0 : i32
    %c0_i32_0 = arith.constant 0 : i32
    %c0_i32_1 = arith.constant 0 : i32
    return %c0_i32, %c0_i32_0 : i32, i32
  }
  func.func @transform_5(%arg0: i32) -> (i32, i32) {
    %c0_i32 = arith.constant 0 : i32
    %c0_i32_0 = arith.constant 0 : i32
    %c0_i32_1 = arith.constant 0 : i32
    return %c0_i32, %c0_i32_0 : i32, i32
  }
  func.func @transform_6(%arg0: i32) -> (i32, i32, i32) {
    %c0_i32 = arith.constant 0 : i32
    %c0_i32_0 = arith.constant 0 : i32
    %c0_i32_1 = arith.constant 0 : i32
    return %arg0, %c0_i32, %c0_i32_0 : i32, i32, i32
  }
}

</mosaic_0001>

<bundles_post_ra>
// kernel: resblock_forward.1
= control target key start
LH: loop header
LB: loop body
LE: loop exit
PB: predicated region body
PF: predicated region fallthrough
CT: control target
= control target key end

     0   :  { %s1086_s21 = smov 0   ;;  %s1387_s0 = inlined_call_operand.vmem [shape: f32[2,4,512], index: 0, kind: input, shape index: {}]   ;;  %s1388_s1 = inlined_call_operand.vmem [shape: f32[1,384], index: 1, kind: input, shape index: {}]   ;;  %s1389_s2 = inlined_call_operand.vmem [shape: bf16[8,36], index: 2, kind: input, shape index: {}]   ;;  %s1390_s3 = inlined_call_operand.vmem [shape: f32[8,1], index: 3, kind: input, shape index: {}]   ;;  %s1391_s4 = inlined_call_operand.vmem [shape: bf16[8,36], index: 4, kind: input, shape index: {}]   ;;  %s1392_s5 = inlined_call_operand.vmem [shape: f32[8,1], index: 5, kind: input, shape index: {}]   ;;  %s1393_s6 = inlined_call_operand.vmem [shape: f32[2,4,384], index: 6, kind: output, shape index: {}]  }
   0x1 LB: > { %s956_s22 = sadd.s32 4294967295, %s1036_s21   ;;  %p960_p0 = scmp.ge.s32.totalorder %s1036_s21, 1  ;;  %s1036_s21 = sphi %s1086_s21, %s16_s21  }
   0x2   : > { %p212_p1 = scmp.lt.s32.totalorder %s1036_s21, 3 }
   0x4   : > { %p213_p2 = pnand %p960_p0, %p212_p1 }
   0x5   : > { %p242_p3 = scmp.lt.s32.totalorder (!%p213_p2), %s956_s22, 1  ;;  %s1038_s27 = smov (!%p213_p2), 90  }
   0x6   : > { %216 = sbr.rel (%p213_p2) target bundleno = 916 (0x394), region = 44  ;;  %s1039_s28 = smov (!%p213_p2), 109  }
   0x7   : > { %s1041_s29 = smov (!%p213_p2), 108   ;;  %s1042_s30 = smov (!%p213_p2), 92  }
   0x8   : > { %s1043_s7 = smov (!%p213_p2), 91   ;;  %s1044_s8 = smov (!%p213_p2), 127  }
   0x9   : > { %s1045_s9 = smov (!%p213_p2), 126   ;;  %s1048_s10 = smov (!%p213_p2), 110  }
   0xa   : > { %s1050_s17 = smov (!%p213_p2), 19  }
   0xb   : > { %s1410_s22 = smov (!%p242_p3, %s956_s22), 1  ;;  %v1040_v8 = vmov 0.0   ;;  %v1046_v21 = vmov 0   ;;  %vm1047_vm0 = vmmov 0   ;;  %v430_v22 = vld [vmem:[%s1390_s3] sm:$0xff]  ;;  %vm374_vm1 = vcmask 736256  }
   0xc   : > { %s973_s23 = sshll.u32 %s1410_s22, 4  ;;  %982 = vmatprep.subr.bf16.mxu1 %v1040_v8  ;;  %481 = vmatprep.mubr.bf16.mxu0 %v1046_v21  ;;  %542 = vst [vmem:[#allocation2] sm:$0xff] %v1046_v21  ;;  %vm378_vm2 = vcmask 1041408   ;;  %vm338_vm3 = vcmask 883712   ;;  %vm350_vm4 = vcmask 752640   ;;  %vm326_vm5 = vcmask 891904  }
   0xd   : > { %s246_s26 = scalar_lea.vmem %s1387_s0, %s973_s23  ;;  %1024 = vset.pattern.permute.xlu0 %v1046_v21  ;;  %1025 = vset.pattern.permute.xlu1 %v1046_v21  ;;  %vm362_vm6 = vcmask 744448   ;;  %vm388_vm7 = vcmask 1043456   ;;  %vm395_vm8 = vcmask 1045504   ;;  %vm1397_vm9 = vcmask 1039360   ;;  %s1002_s24 = smul.u32 12, %s1410_s22 }
   0xe   : > { %v1100_v0 = vld [vmem:[%s246_s26 + $0x8] sm:$0xff]  ;;  %v1102_v1 = vld [vmem:[%s246_s26] sm:$0xff]  ;;  %988 = vmatprep.mubr.msk.bf16.mxu1 %vm1047_vm0, %v1040_v8  ;;  %vm1396_vm10 = vcmask 1031168   ;;  %vm1395_vm11 = vcmask 900096   ;;  %vm1394_vm12 = vcmask 293888   ;;  %vm590_vm13 = vcmask 1041560  }
   0xf   : > { %v1106_v2 = vpack.c.bf16 %v1100_v0, %v1100_v0  ;;  %v1110_v3 = vpack.c.bf16 %v1102_v1, %v1102_v1  ;;  %v1114_v4 = vcombine.high %v1102_v1, %v1102_v1  ;;  %v1141_v11 = vcombine.high %v1100_v0, %v1100_v0 }
  0x10   : > { %vm591_vm14 = vcmask 1043458  }
  0x11   : > { %370 = vrot.lane.b32.xlu1 %v1106_v2, %s1038_s27  ;;  %366 = vrot.lane.b32.xlu0 %v1110_v3, %s1038_s27  ;;  %v1122_v5 = vpack.c.bf16 %v1114_v4, %v1114_v4  ;;  %v272_v6 = vrot.slane %v1106_v2, 6  ;;  %v270_v9 = vrot.slane %v1110_v3, 6  ;;  %v288_v12 = vrot.slane %v1106_v2, 4  ;;  %vm592_vm15 = vmor %vm591_vm14, %vm590_vm13 }
  0x12   : > { %v265_v13 = vpack.c.bf16 %v1141_v11, %v1141_v11  ;;  %v286_v14 = vrot.slane %v1110_v3, 4  ;;  %v304_v16 = vrot.slane %v1106_v2, 2  ;;  %v302_v18 = vrot.slane %v1110_v3, 2 }
  0x13   : > { %v271_v7 = vrot.slane %v1122_v5, 6  ;;  %v287_v10 = vrot.slane %v1122_v5, 4  ;;  %v303_v15 = vrot.slane %v1122_v5, 2  ;;  %vm1407_vm14 = vcmask 293888  }
  0x14   : > { %v273_v17 = vrot.slane %v265_v13, 6  ;;  %v289_v19 = vrot.slane %v265_v13, 4  ;;  %v305_v20 = vrot.slane %v265_v13, 2 }
  0x15   : > { %322 = vrot.lane.b32.xlu0 %v1106_v2, %s1039_s28  ;;  %320 = vrot.lane.b32.xlu1 %v1122_v5, %s1039_s28 }
  0x19   : > { %318 = vrot.lane.b32.xlu1 %v1110_v3, %s1039_s28  ;;  %368 = vrot.lane.b32.xlu0 %v1122_v5, %s1038_s27 }
  0x1d   : > { %334 = vrot.lane.b32.xlu0 %v272_v6, %s1041_s29  ;;  %332 = vrot.lane.b32.xlu1 %v271_v7, %s1041_s29 }
  0x21   : > { %330 = vrot.lane.b32.xlu0 %v270_v9, %s1041_s29  ;;  %344 = vrot.lane.b32.xlu1 %v287_v10, %s1042_s30 }
  0x25   : > { %346 = vrot.lane.b32.xlu0 %v288_v12, %s1042_s30  ;;  %372 = vrot.lane.b32.xlu1 %v265_v13, %s1038_s27 }
  0x29   : > { %342 = vrot.lane.b32.xlu0 %v286_v14, %s1042_s30  ;;  %356 = vrot.lane.b32.xlu1 %v303_v15, %s1043_s7 }
  0x2d   : > { %358 = vrot.lane.b32.xlu0 %v304_v16, %s1043_s7  ;;  %324 = vrot.lane.b32.xlu1 %v265_v13, %s1039_s28 }
  0x31   : > { %336 = vrot.lane.b32.xlu0 %v273_v17, %s1041_s29  ;;  %354 = vrot.lane.b32.xlu1 %v302_v18, %s1043_s7 }
  0x35   : > { %276 = vrot.lane.b32.xlu0 %v271_v7, %s1044_s8  ;;  %278 = vrot.lane.b32.xlu1 %v272_v6, %s1044_s8 }
  0x39   : > { %348 = vrot.lane.b32.xlu0 %v289_v19, %s1042_s30  ;;  %274 = vrot.lane.b32.xlu1 %v270_v9, %s1044_s8 }
  0x3d   : > { %292 = vrot.lane.b32.xlu0 %v287_v10, %s1045_s9  ;;  %294 = vrot.lane.b32.xlu1 %v288_v12, %s1045_s9 }
  0x41   : > { %360 = vrot.lane.b32.xlu0 %v305_v20, %s1043_s7  ;;  %290 = vrot.lane.b32.xlu1 %v286_v14, %s1045_s9 }
  0x45   : > { %308 = vrot.lane.b32.xlu0 %v303_v15, %s1048_s10  ;;  %310 = vrot.lane.b32.xlu1 %v304_v16, %s1048_s10 }
  0x49   : > { %280 = vrot.lane.b32.xlu0 %v273_v17, %s1044_s8  ;;  %306 = vrot.lane.b32.xlu1 %v302_v18, %s1048_s10 }
  0x4d   : > { %296 = vrot.lane.b32.xlu0 %v289_v19, %s1045_s9  ;;  %312 = vrot.lane.b32.xlu1 %v305_v20, %s1048_s10 }
  0x51   : > { %433 = vperm.xlu0 %1024, %v430_v22  }
  0x83   : > { %v371_v23 = vpop.permute.xlu1 %370  ;;  %v367_v24 = vpop.permute.xlu0 %366 }
  0x87   : > { %v323_v25 = vpop.permute.xlu0 %322  ;;  %v321_v26 = vpop.permute.xlu1 %320 }
  0x88   : > { %v328_v44 = vsel %vm326_vm5, %v321_v26, %v323_v25 }
  0x8b   : > { %v319_v27 = vpop.permute.xlu1 %318  ;;  %v369_v28 = vpop.permute.xlu0 %368 }
  0x8c   : > { %v376_v29 = vsel %vm374_vm1, %v369_v28, %v371_v23  ;;  %v375_v30 = vsel %vm374_vm1, %v367_v24, %v369_v28  ;;  %v327_v53 = vsel %vm326_vm5, %v319_v27, %v321_v26 }
  0x8d   : > { %964 = vmatprep.subr.msk.bf16.mxu0 %vm378_vm2, %v376_v29  ;;  %v441_v31 = vsel %vm378_vm2, %v375_v30, 0 }
  0x8e   : > { %460 = vmatpush1.bf16.msra.mxu0 %v441_v31 }
  0x8f   : > { %v335_v32 = vpop.permute.xlu0 %334  ;;  %v333_v33 = vpop.permute.xlu1 %332 }
  0x90   : > { %v340_v42 = vsel %vm338_vm3, %v333_v33, %v335_v32 }
  0x91   : > { %v410_v45 = vsel %vm378_vm2, %v328_v44, %v340_v42 }
  0x93   : > { %v331_v34 = vpop.permute.xlu0 %330  ;;  %v345_v35 = vpop.permute.xlu1 %344 }
  0x94   : > { %v339_v48 = vsel %vm338_vm3, %v331_v34, %v333_v33 }
  0x95   : > { %v407_v54 = vsel %vm378_vm2, %v327_v53, %v339_v48 }
  0x97   : > { %v347_v36 = vpop.permute.xlu0 %346  ;;  %v373_v37 = vpop.permute.xlu1 %372 }
  0x98   : > { %v377_v38 = vsel %vm374_vm1, %v371_v23, %v373_v37  ;;  %v352_v43 = vsel %vm350_vm4, %v345_v35, %v347_v36 }
  0x99   : > { %v447_v39 = vsel %vm378_vm2, %v377_v38, 0  ;;  %v417_v50 = vsel %vm388_vm7, %v410_v45, %v352_v43 }
  0x9a   : > { %983 = vmatpush3.bf16.msra.mxu1 %v447_v39 }
  0x9b   : > { %v343_v40 = vpop.permute.xlu0 %342  ;;  %v357_v41 = vpop.permute.xlu1 %356  ;;  %984 = vmatprep.subr.bf16.mxu1 %v1040_v8 }
  0x9c   : > { %v351_v51 = vsel %vm350_vm4, %v343_v40, %v345_v35 }
  0x9d   : > { %v415_v58 = vsel %vm388_vm7, %v407_v54, %v351_v51 }
  0x9f   : > { %v359_v46 = vpop.permute.xlu0 %358  ;;  %v325_v47 = vpop.permute.xlu1 %324 }
  0xa0   : > { %v364_v49 = vsel %vm362_vm6, %v357_v41, %v359_v46  ;;  %v329_v12 = vsel %vm326_vm5, %v323_v25, %v325_v47  ;;  %v253_v47 = vld [vmem:[%s1388_s1] sm:$0x7] }
  0xa1   : > { %v424_v52 = vsel %vm395_vm8, %v417_v50, %v364_v49 }
  0xa2   : > { %461 = vmatprep.subr.bf16.mxu0 %v424_v52 }
  0xa3   : > { %v337_v55 = vpop.permute.xlu0 %336  ;;  %v355_v56 = vpop.permute.xlu1 %354 }
  0xa4   : > { %v363_v57 = vsel %vm362_vm6, %v355_v56, %v357_v41  ;;  %v341_v9 = vsel %vm338_vm3, %v335_v32, %v337_v55  ;;  %v1049_v55 = vmov 1983009808  }
  0xa5   : > { %v421_v59 = vsel %vm395_vm8, %v415_v58, %v363_v57  ;;  %v413_v13 = vsel %vm378_vm2, %v329_v12, %v341_v9  ;;  %v570_v56 = vunpack.c.l.s4 %v1049_v55 }
  0xa6   : > { %462 = vmatpush1.bf16.msra.mxu0 %v421_v59 }
  0xa7   : > { %v277_v60 = vpop.permute.xlu0 %276  ;;  %v279_v61 = vpop.permute.xlu1 %278  ;;  %v571_v12 = vunpack.c.0.s8 %v570_v56 }
  0xa8   : > { %v284_v16 = vsel %vm1397_vm9, %v277_v60, %v279_v61 }
  0xa9   : > { %v384_v22 = vsel %vm378_vm2, %v1122_v5, %v284_v16 }
  0xab   : > { %v349_v62 = vpop.permute.xlu0 %348  ;;  %v275_v63 = vpop.permute.xlu1 %274 }
  0xac   : > { %v353_v10 = vsel %vm350_vm4, %v347_v36, %v349_v62  ;;  %v283_v25 = vsel %vm1397_vm9, %v275_v63, %v277_v60  ;;  %v429_v36 = vld [vmem:[%s1389_s2] sm:$0xf] }
  0xad   : > { %v419_v18 = vsel %vm388_vm7, %v413_v13, %v353_v10  ;;  %v381_v30 = vsel %vm378_vm2, %v1110_v3, %v283_v25 }
  0xaf   : > { %v293_v6 = vpop.permute.xlu0 %292  ;;  %v295_v7 = vpop.permute.xlu1 %294 }
  0xb0   : > { %v300_v19 = vsel %vm1396_vm10, %v293_v6, %v295_v7 }
  0xb1   : > { %v392_v27 = vsel %vm388_vm7, %v384_v22, %v300_v19 }
  0xb3   : > { %v361_v14 = vpop.permute.xlu0 %360  ;;  %v291_v15 = vpop.permute.xlu1 %290 }
  0xb4   : > { %v365_v17 = vsel %vm362_vm6, %v359_v46, %v361_v14  ;;  %v299_v28 = vsel %vm1396_vm10, %v291_v15, %v293_v6 }
  0xb5   : > { %v427_v20 = vsel %vm395_vm8, %v419_v18, %v365_v17  ;;  %v390_v33 = vsel %vm388_vm7, %v381_v30, %v299_v28 }
  0xb6   : > { %985 = vmatpush3.bf16.msra.mxu1 %v427_v20 }
  0xb7   : > { %v309_v23 = vpop.permute.xlu0 %308  ;;  %v311_v24 = vpop.permute.xlu1 %310  ;;  %986 = vmatprep.subr.bf16.mxu1 %v1040_v8 }
  0xb8   : > { %v316_v26 = vsel %vm1395_vm11, %v309_v23, %v311_v24 }
  0xb9   : > { %v400_v29 = vsel %vm395_vm8, %v392_v27, %v316_v26 }
  0xba   : > { %463 = vmatprep.subr.bf16.mxu0 %v400_v29 }
  0xbb   : > { %v281_v31 = vpop.permute.xlu0 %280  ;;  %v307_v5 = vpop.permute.xlu1 %306 }
  0xbc   : > { %v315_v32 = vsel %vm1395_vm11, %v307_v5, %v309_v23  ;;  %v285_v34 = vsel %vm1397_vm9, %v279_v61, %v281_v31 }
  0xbd   : > { %v397_v35 = vsel %vm395_vm8, %v390_v33, %v315_v32  ;;  %v387_v3 = vsel %vm378_vm2, %v1106_v2, %v285_v34  ;;  %v544_v2 = vlaneseq }
  0xbe   : > { %464 = vmatpush1.bf16.msra.mxu0 %v397_v35 }
  0xbf   : > { %v297_v37 = vpop.permute.xlu0 %296  ;;  %v313_v38 = vpop.permute.xlu1 %312  ;;  %v545_v43 = vshrl.u32 %v544_v2, 7 }
  0xc0   : > { %v301_v39 = vsel %vm1396_vm10, %v295_v7, %v297_v37  ;;  %v317_v40 = vsel %vm1395_vm11, %v311_v24, %v313_v38  ;;  %vm595_vm11 = vcmask 154630   ;;  %vm587_vm10 = vcmask 154624  }
  0xc1   : > { %965 = vmatmul.mubr.msk.bf16.vlgmr.msra.gmra.mxu0 %vm1394_vm12, %v429_v36  ;;  %v394_v41 = vsel %vm388_vm7, %v387_v3, %v301_v39  ;;  %v546_v46 = vsub.s32 0, %v545_v43  ;;  %v550_v49 = vsub.s32 1, %v545_v43  ;;  %v554_v54 = vsub.s32 2, %v545_v43  ;;  %v766_v3 = vld [vmem:[%s1392_s5] sm:$0xff] }
  0xc2   : > { %v403_v42 = vsel %vm395_vm8, %v394_v41, %v317_v40  ;;  %816 = vmatprep.mubr.bf16.mxu0 %v1046_v21  ;;  %v574_v19 = vsub.s32 %v571_v12, %v545_v43 }
  0xc3   : > { %987 = vmatpush3.bf16.msra.mxu1 %v403_v42  ;;  %v547_v52 = vrot.slane %v253_v47, %v546_v46  ;;  %v551_v59 = vrot.slane %v253_v47, %v550_v49  ;;  %v555_v10 = vrot.slane %v253_v47, %v554_v54 }
  0xc4   : > { %992 = vmatprep.subr.bf16.mxu1 %v1040_v8 }
  0xc6   : > { %989 = vmatmul.mubr.msk.bf16.vlgmr.msra.gmra.mxu1 %vm1394_vm12, %v429_v36 }
  0xc7   : > { %998 = vmatprep.mubr.msk.bf16.mxu1 %vm1047_vm0, %v1040_v8  ;;  %vm593_vm0 = vcmask 1045508  }
  0xc8   : > { %vm594_vm12 = vmor %vm593_vm0, %vm592_vm15 }
  0xc9   : > { %vm596_vm9 = vmor %vm595_vm11, %vm594_vm12  ;;  %vm1401_vm11 = vcmask 900096  }
  0xca   : > { %vm1408_vm15 = vmmov %vm1407_vm14 }
  0xcc   : > { %v434_v44 = vpop.permute.xlu0 %433 }
 0x181   : > { %v483_v45 = vpop.f32.mrf.mxu0 }
 0x182   : > { %v484_v48 = vadd.f32 %v483_v45, %v434_v44 }
 0x183   : > { %v485_v21 = vpop.f32.mrf.mxu0 }
 0x184   : > { %v533_v50 = vrot.slane %v484_v48, 4  ;;  %v486_v51 = vadd.f32 %v485_v21, %v434_v44 }
 0x185   : > { %v487_v53 = vpop.f32.mrf.mxu0 }
 0x186   : > { %v539_v57 = vmax.f32 %v484_v48, %v533_v50  ;;  %v534_v58 = vrot.slane %v486_v51, 4  ;;  %v524_v60 = vpop.f32.mrf.mxu1 }
 0x187   : > { %v525_v61 = vadd.f32 %v524_v60, %v434_v44  ;;  %v488_v62 = vpop.f32.mrf.mxu0 }
 0x188   : > { %v540_v63 = vmax.f32 %v486_v51, %v534_v58  ;;  %v990_v6 = vpop.f32.mrf.mxu1  ;;  %v559_v7 = vmul.f32 %v547_v52, %v539_v57 }
 0x189   : > { %v535_v9 = vrot.slane %v525_v61, 4 }
 0x18a   : > { %v560_v13 = vmul.f32 %v551_v59, %v540_v63  ;;  %v527_v14 = vpop.f32.mrf.mxu1 }
 0x18b   : > { %v541_v15 = vmax.f32 %v525_v61, %v535_v9 }
 0x18c   : > { %v991_v16 = vpop.f32.mrf.mxu1  ;;  %v967_v17 = vpack.c.bf16 %v560_v13, %v559_v7 }
 0x18d   : > { %v561_v18 = vmul.f32 %v555_v10, %v541_v15 }
 0x18e   : > { %v575_v22 = vrot.slane %v967_v17, %v574_v19 }
 0x18f   : > { %v564_v20 = vpack.c.bf16 %v561_v18, %v561_v18 }
 0x191   : > { %v582_v23 = vrot.slane %v564_v20, %v574_v19 }
 0x193   : > { %v583_v24 = vcombine.low %v575_v22, %v582_v23 }
 0x195   : > { %584 = vrot.lane.b32.xlu1 %v583_v24, %s1050_s17 }
 0x207   : > { %v585_v25 = vpop.permute.xlu1 %584 }
 0x208   : > { %v586_v26 = vrot.slane %v585_v25, 6 }
 0x20a   : > { %v588_v27 = vsel %vm587_vm10, %v586_v26, %v585_v25 }
 0x20b   : > { %597 = vst.msk [vmem:[#allocation2] sm:$0xff] %vm596_vm9, %v588_v27  ;;  %vm1398_vm9 = vcmask 1039360  }
 0x20c   : > { %vm1399_vm10 = vmmov %vm1398_vm9 }
 0x20d   : > { %vm1404_vm13 = vmmov %vm1398_vm9 }
 0x212   : > { %v598_v28 = vld [vmem:[#allocation2] sm:$0xff] }
 0x213   : > { %v1245_v29 = vrot.slane %v598_v28, %v574_v19  ;;  %v600_v30 = vcombine.high %v598_v28, %v598_v28  ;;  %v616_v5 = vcombine.low %v598_v28, %v598_v28 }
 0x215   : > { %662 = vrot.lane.b32.xlu0 %v1245_v29, %s1039_s28  ;;  %706 = vrot.lane.b32.xlu1 %v1245_v29, %s1038_s27  ;;  %v1255_v31 = vrot.slane %v600_v30, %v574_v19  ;;  %v1267_v32 = vcombine.high %v1245_v29, %v1245_v29  ;;  %v623_v33 = vrot.slane %v616_v5, %v574_v19 }
 0x216   : > { %v636_v34 = vcombine.low %v1245_v29, %v1245_v29 }
 0x217   : > { %v624_v35 = vcombine.high %v623_v33, %v623_v33  ;;  %v637_v36 = vcombine.low %v1255_v31, %v1255_v31  ;;  %v661_v37 = vcombine.high %v1255_v31, %v1255_v31  ;;  %v649_v38 = vcombine.low %v623_v33, %v623_v33 }
 0x219   : > { %686 = vrot.lane.b32.xlu0 %v1245_v29, %s1042_s30  ;;  %677 = vrot.lane.b32.xlu1 %v1245_v29, %s1041_s29 }
 0x21d   : > { %629 = vrot.lane.b32.xlu0 %v1245_v29, %s1044_s8  ;;  %710 = vrot.lane.b32.xlu1 %v1255_v31, %s1038_s27 }
 0x221   : > { %640 = vrot.lane.b32.xlu0 %v1245_v29, %s1045_s9  ;;  %666 = vrot.lane.b32.xlu1 %v1255_v31, %s1039_s28 }
 0x225   : > { %708 = vrot.lane.b32.xlu0 %v1267_v32, %s1038_s27  ;;  %673 = vrot.lane.b32.xlu1 %v623_v33, %s1041_s29 }
 0x229   : > { %664 = vrot.lane.b32.xlu0 %v1267_v32, %s1039_s28  ;;  %697 = vrot.lane.b32.xlu1 %v623_v33, %s1043_s7 }
 0x22d   : > { %684 = vrot.lane.b32.xlu0 %v636_v34, %s1042_s30  ;;  %625 = vrot.lane.b32.xlu1 %v623_v33, %s1044_s8 }
 0x231   : > { %699 = vrot.lane.b32.xlu0 %v636_v34, %s1043_s7  ;;  %679 = vrot.lane.b32.xlu1 %v1267_v32, %s1041_s29 }
 0x235   : > { %638 = vrot.lane.b32.xlu0 %v636_v34, %s1045_s9  ;;  %652 = vrot.lane.b32.xlu1 %v623_v33, %s1048_s10 }
 0x239   : > { %654 = vrot.lane.b32.xlu0 %v636_v34, %s1048_s10  ;;  %690 = vrot.lane.b32.xlu1 %v1255_v31, %s1042_s30 }
 0x23d   : > { %675 = vrot.lane.b32.xlu0 %v624_v35, %s1041_s29  ;;  %688 = vrot.lane.b32.xlu1 %v637_v36, %s1042_s30 }
 0x241   : > { %712 = vrot.lane.b32.xlu0 %v661_v37, %s1038_s27  ;;  %695 = vrot.lane.b32.xlu1 %v649_v38, %s1043_s7  ;;  %s251_s27 = scalar_lea.vmem %s1393_s6, %s1002_s24 }
 0x245   : > { %631 = vrot.lane.b32.xlu0 %v1267_v32, %s1044_s8  ;;  %627 = vrot.lane.b32.xlu1 %v624_v35, %s1044_s8 }
 0x249   : > { %668 = vrot.lane.b32.xlu0 %v661_v37, %s1039_s28  ;;  %642 = vrot.lane.b32.xlu1 %v637_v36, %s1045_s9 }
 0x24d   : > { %650 = vrot.lane.b32.xlu0 %v649_v38, %s1048_s10  ;;  %701 = vrot.lane.b32.xlu1 %v1245_v29, %s1043_s7 }
 0x251   : > { %656 = vrot.lane.b32.xlu0 %v1245_v29, %s1048_s10  ;;  %644 = vrot.lane.b32.xlu1 %v1255_v31, %s1045_s9 }
 0x255   : > { %769 = vperm.xlu1 %1025, %v766_v3   ;;  %877 = vrot.lane.b32.xlu0 %v1102_v1, %s1039_s28 }
 0x259   : > { %879 = vrot.lane.b32.xlu1 %v1114_v4, %s1039_s28  ;;  %881 = vrot.lane.b32.xlu0 %v1100_v0, %s1039_s28 }
 0x25d   : > { %883 = vrot.lane.b32.xlu1 %v1141_v11, %s1039_s28 }
 0x287   : > { %v663_v39 = vpop.permute.xlu0 %662  ;;  %v707_v40 = vpop.permute.xlu1 %706 }
 0x28b   : > { %v687_v41 = vpop.permute.xlu0 %686  ;;  %v678_v42 = vpop.permute.xlu1 %677 }
 0x28f   : > { %v1318_v2 = vpop.permute.xlu0 %629  ;;  %v711_v43 = vpop.permute.xlu1 %710 }
 0x293   : > { %v641_v44 = vpop.permute.xlu0 %640  ;;  %v667_v45 = vpop.permute.xlu1 %666 }
 0x297   : > { %v709_v46 = vpop.permute.xlu0 %708  ;;  %v674_v1 = vpop.permute.xlu1 %673 }
 0x298   : > { %v714_v47 = vsel %vm374_vm1, %v707_v40, %v709_v46  ;;  %v715_v4 = vsel %vm374_vm1, %v709_v46, %v711_v43  ;;  %v765_v46 = vld [vmem:[%s1391_s4] sm:$0xf] }
 0x299   : > { %v776_v0 = vsel %vm378_vm2, %v714_v47, 0  ;;  %968 = vmatprep.subr.msk.bf16.mxu0 %vm378_vm2, %v715_v4 }
 0x29a   : > { %795 = vmatpush1.bf16.msra.mxu0 %v776_v0 }
 0x29b   : > { %v665_v11 = vpop.permute.xlu0 %664  ;;  %v698_v48 = vpop.permute.xlu1 %697 }
 0x29c   : > { %v670_v56 = vsel %vm326_vm5, %v663_v39, %v665_v11  ;;  %v671_v59 = vsel %vm326_vm5, %v665_v11, %v667_v45 }
 0x29f   : > { %v685_v49 = vpop.permute.xlu0 %684  ;;  %v626_v21 = vpop.permute.xlu1 %625 }
 0x2a0   : > { %v692_v10 = vsel %vm350_vm4, %v685_v49, %v687_v41 }
 0x2a3   : > { %v700_v50 = vpop.permute.xlu0 %699  ;;  %v680_v51 = vpop.permute.xlu1 %679 }
 0x2a4   : > { %v704_v7 = vsel %vm362_vm6, %v698_v48, %v700_v50  ;;  %v683_v27 = vsel %vm338_vm3, %v678_v42, %v680_v51 }
 0x2a7   : > { %v639_v52 = vpop.permute.xlu0 %638  ;;  %v653_v53 = vpop.permute.xlu1 %652 }
 0x2ab   : > { %v655_v54 = vpop.permute.xlu0 %654  ;;  %v691_v55 = vpop.permute.xlu1 %690 }
 0x2ac   : > { %v659_v33 = vsel %vm1401_vm11, %v653_v53, %v655_v54 }
 0x2af   : > { %v676_v57 = vpop.permute.xlu0 %675  ;;  %v689_v58 = vpop.permute.xlu1 %688 }
 0x2b0   : > { %v681_v60 = vsel %vm338_vm3, %v674_v1, %v676_v57  ;;  %v682_v61 = vsel %vm338_vm3, %v676_v57, %v678_v42  ;;  %v693_v62 = vsel %vm350_vm4, %v687_v41, %v689_v58  ;;  %v694_v3 = vsel %vm350_vm4, %v689_v58, %v691_v55  ;;  %vm1403_vm3 = vmmov %vm1401_vm11 }
 0x2b1   : > { %v743_v63 = vsel %vm378_vm2, %v670_v56, %v681_v60  ;;  %v746_v6 = vsel %vm378_vm2, %v671_v59, %v682_v61  ;;  %vm1405_vm4 = vmmov %vm1403_vm3 }
 0x2b2   : > { %v753_v9 = vsel %vm388_vm7, %v746_v6, %v693_v62  ;;  %v751_v17 = vsel %vm388_vm7, %v743_v63, %v692_v10 }
 0x2b3   : > { %v713_v12 = vpop.permute.xlu0 %712  ;;  %v696_v13 = vpop.permute.xlu1 %695  ;;  %v760_v14 = vsel %vm395_vm8, %v753_v9, %v704_v7 }
 0x2b4   : > { %v716_v15 = vsel %vm374_vm1, %v711_v43, %v713_v12  ;;  %v703_v16 = vsel %vm362_vm6, %v696_v13, %v698_v48  ;;  %796 = vmatprep.subr.bf16.mxu0 %v760_v14  ;;  %vm1400_vm1 = vcmask 1031168  }
 0x2b5   : > { %v782_v18 = vsel %vm378_vm2, %v716_v15, 0  ;;  %v757_v19 = vsel %vm395_vm8, %v751_v17, %v703_v16  ;;  %vm1402_vm12 = vmmov %vm1400_vm1 }
 0x2b6   : > { %797 = vmatpush1.bf16.msra.mxu0 %v757_v19  ;;  %993 = vmatpush3.bf16.msra.mxu1 %v782_v18  ;;  %v646_v38 = vsel %vm1402_vm12, %v639_v52, %v641_v44 }
 0x2b7   : > { %v632_v20 = vpop.permute.xlu0 %631  ;;  %v628_v22 = vpop.permute.xlu1 %627  ;;  %994 = vmatprep.subr.bf16.mxu1 %v1040_v8 }
 0x2b8   : > { %v634_v23 = vsel %vm1398_vm9, %v628_v22, %v1318_v2  ;;  %v633_v24 = vsel %vm1399_vm10, %v626_v21, %v628_v22  ;;  %v635_v43 = vsel %vm1404_vm13, %v1318_v2, %v632_v20 }
 0x2b9   : > { %v722_v28 = vsel %vm378_vm2, %v1267_v32, %v634_v23  ;;  %v719_v34 = vsel %vm378_vm2, %v1245_v29, %v633_v24  ;;  %v725_v4 = vsel %vm378_vm2, %v1255_v31, %v635_v43 }
 0x2ba   : > { %v727_v42 = vsel %vm388_vm7, %v719_v34, %v646_v38 }
 0x2bb   : > { %v669_v25 = vpop.permute.xlu0 %668  ;;  %v643_v26 = vpop.permute.xlu1 %642 }
 0x2bc   : > { %v672_v30 = vsel %vm326_vm5, %v667_v45, %v669_v25  ;;  %v647_v5 = vsel %vm1400_vm1, %v641_v44, %v643_v26 }
 0x2bd   : > { %v749_v35 = vsel %vm378_vm2, %v672_v30, %v683_v27  ;;  %v729_v36 = vsel %vm388_vm7, %v722_v28, %v647_v5 }
 0x2be   : > { %v736_v37 = vsel %vm395_vm8, %v729_v36, %v659_v33  ;;  %v755_v29 = vsel %vm388_vm7, %v749_v35, %v694_v3 }
 0x2bf   : > { %v651_v32 = vpop.permute.xlu0 %650  ;;  %798 = vmatprep.subr.bf16.mxu0 %v736_v37  ;;  %v702_v39 = vpop.permute.xlu1 %701 }
 0x2c0   : > { %v658_v40 = vsel %vm1403_vm3, %v651_v32, %v653_v53  ;;  %v705_v41 = vsel %vm362_vm6, %v700_v50, %v702_v39  ;;  %vm1406_vm6 = vmmov %vm1400_vm1 }
 0x2c1   : > { %v733_v45 = vsel %vm395_vm8, %v727_v42, %v658_v40  ;;  %v763_v44 = vsel %vm395_vm8, %v755_v29, %v705_v41 }
 0x2c2   : > { %799 = vmatpush1.bf16.msra.mxu0 %v733_v45  ;;  %995 = vmatpush3.bf16.msra.mxu1 %v763_v44 }
 0x2c3   : > { %v657_v1 = vpop.permute.xlu0 %656  ;;  %v645_v47 = vpop.permute.xlu1 %644  ;;  %996 = vmatprep.subr.bf16.mxu1 %v1040_v8 }
 0x2c4   : > { %v660_v0 = vsel %vm1405_vm4, %v655_v54, %v657_v1  ;;  %v648_v2 = vsel %vm1406_vm6, %v643_v26, %v645_v47 }
 0x2c5   : > { %v731_v11 = vsel %vm388_vm7, %v725_v4, %v648_v2  ;;  %969 = vmatmul.mubr.msk.bf16.vlgmr.msra.gmra.mxu0 %vm1407_vm14, %v765_v46 }
 0x2c6   : > { %v739_v48 = vsel %vm395_vm8, %v731_v11, %v660_v0 }
 0x2c7   : > { %997 = vmatpush3.bf16.msra.mxu1 %v739_v48  ;;  %v878_v21 = vpop.permute.xlu0 %877 }
 0x2ca   : > { %999 = vmatmul.mubr.msk.bf16.vlgmr.msra.gmra.mxu1 %vm1408_vm15, %v765_v46 }
 0x2cb   : > { %v882_v54 = vpop.permute.xlu0 %881 }
 0x2d0   : > { %v770_v49 = vpop.permute.xlu1 %769 }
 0x2d4   : > { %v880_v31 = vpop.permute.xlu1 %879 }
 0x2d5   : > { %v886_v59 = vsel %vm326_vm5, %v878_v21, %v880_v31  ;;  %v887_v61 = vsel %vm326_vm5, %v880_v31, %v882_v54 }
 0x2d8   : > { %v884_v9 = vpop.permute.xlu1 %883 }
 0x2d9   : > { %v888_v16 = vsel %vm326_vm5, %v882_v54, %v884_v9 }
 0x385   : > { %v818_v8 = vpop.f32.mrf.mxu0 }
 0x386   : > { %v819_v50 = vadd.f32 %v818_v8, %v770_v49 }
 0x387   : > { %v820_v51 = vpop.f32.mrf.mxu0 }
 0x388   : > { %v868_v52 = vrot.slane %v819_v50, 4  ;;  %v821_v53 = vadd.f32 %v820_v51, %v770_v49 }
 0x389   : > { %v822_v55 = vpop.f32.mrf.mxu0 }
 0x38a   : > { %v869_v56 = vrot.slane %v821_v53, 4  ;;  %v874_v57 = vmax.f32 %v819_v50, %v868_v52  ;;  %v859_v58 = vpop.f32.mrf.mxu1 }
 0x38b   : > { %v860_v60 = vadd.f32 %v859_v58, %v770_v49  ;;  %v823_v62 = vpop.f32.mrf.mxu0 }
 0x38c   : > { %v875_v63 = vmax.f32 %v821_v53, %v869_v56  ;;  %v1000_v6 = vpop.f32.mrf.mxu1  ;;  %v892_v10 = vadd.f32 %v886_v59, %v874_v57 }
 0x38d   : > { %v870_v7 = vrot.slane %v860_v60, 4 }
 0x38e   : > { %v893_v12 = vadd.f32 %v887_v61, %v875_v63  ;;  %v862_v13 = vpop.f32.mrf.mxu1 }
 0x38f   : > { %v876_v14 = vmax.f32 %v860_v60, %v870_v7 }
 0x390   : > { %v897_v15 = vcombine.low %v892_v10, %v893_v12  ;;  %v1001_v17 = vpop.f32.mrf.mxu1 }
 0x391   : > { %v894_v18 = vadd.f32 %v888_v16, %v876_v14 }
 0x392   : > { %899 = vst [vmem:[%s251_s27] sm:$0xff] %v897_v15 }
 0x393   : > { %900 = vst [vmem:[%s251_s27 + $0x8] sm:$0xf] %v894_v18 }
 0x394 PF: > { %s16_s21 = sadd.s32 1, %s1036_s21  }
 0x395   : > { %p13_p4 = scmp.ge.s32.totalorder %s16_s21, 4  }
 0x397   :  { %15 = sbr.rel (!%p13_p4) target bundleno = 1 (0x1), region = 74 }

</bundles_post_ra>
